<compile_context>
chip_gen: v6e
topology: v6e:2x2x1
jax: 0.10.0
libtpu: 0.0.40
codegen_flags: <defaults>
</compile_context>

<pallas_src>
import math
import functools

import jax
import jax.numpy as jnp
from jax.experimental import pallas as pl
from jax.experimental.pallas import tpu as pltpu


_VMEM = pl.BlockSpec(memory_space=pltpu.MemorySpace.VMEM)


# ----------------------------- Pallas kernels ------------------------------

def _seco_inter_head_kernel(q_ref, k_ref, pos_ref, negloc_ref, out_ref, *,
                            inv_temp):
    """Left slab of the inter output: positives column + local negatives.

    out_ref is (2B, W) with W a multiple of 128, so both stores are
    full-width unmasked vst (lane-dense).  Layout:
      col 0           : l_pos_k (rows :B) / l_pos_set (rows B:)
      cols 1..1+B*Nn  : q @ neg_flat.T duplicated into both row halves
      remaining cols  : zero padding (sliced off in the wrapper)
    """
    B = q_ref.shape[0]
    q32 = q_ref[...].astype(jnp.float32)       # (B, D)
    k32 = k_ref[...].astype(jnp.float32)       # (B, D)
    pos = pos_ref[...].astype(jnp.float32)     # (B, P, D)

    l_pos_k = jnp.sum(q32 * k32, axis=-1, keepdims=True)                # (B,1)
    l_pos_set = jnp.mean(jnp.sum(q32[:, None, :] * pos, axis=-1),
                         axis=1, keepdims=True)                         # (B,1)

    # Local negatives: neg_flat is passed pre-transposed as (D, B*Nn) so the
    # contraction is MXU-native.
    lneg_loc = jnp.dot(q_ref[...], negloc_ref[...],
                       preferred_element_type=jnp.float32)              # (B, B*Nn)

    row_top = jnp.concatenate([l_pos_k, lneg_loc], axis=-1) * inv_temp
    row_bot = jnp.concatenate([l_pos_set, lneg_loc], axis=-1) * inv_temp
    pad = out_ref.shape[1] - row_top.shape[1]
    if pad:
        z = jnp.zeros((B, pad), jnp.float32)
        row_top = jnp.concatenate([row_top, z], axis=-1)
        row_bot = jnp.concatenate([row_bot, z], axis=-1)
    out_ref[:B, :] = row_top       # full-width stores; sublane-aligned for B%8==0
    out_ref[B:, :] = row_bot


def _seco_bank_kernel(q_ref, memt_ref, out_ref, *, inv_temp):
    """One (B, TM) tile of q @ memory.T.

    Bank stored transposed (D, Q) in bf16: MXU-native (B,D)@(D,TM), f32
    accumulate, no per-tile XLU transpose, half the HBM read bytes.
    """
    out_ref[...] = jnp.dot(q_ref[...], memt_ref[...],
                           preferred_element_type=jnp.float32) * inv_temp
    # TODO(synk): for B >= 64 (or bf16-tolerant consumers) emit the tile as
    # bf16 to also halve the write-side traffic.


def _seco_intra_kernel(q_ref, k_ref, pos_ref, neg_ref, out_ref, *, inv_temp):
    q32 = q_ref[...].astype(jnp.float32)       # (B, D)
    k32 = k_ref[...].astype(jnp.float32)       # (B, D)
    pos = pos_ref[...].astype(jnp.float32)     # (B, P, D)
    neg = neg_ref[...].astype(jnp.float32)     # (B, Nn, D)

    l_pos_k = jnp.sum(q32 * k32, axis=-1, keepdims=True)       # (B, 1)
    l_pos_neg = jnp.sum(q32[:, None, :] * pos, axis=-1)        # (B, P)
    l_neg = jnp.sum(q32[:, None, :] * neg, axis=-1)            # (B, Nn)

    vals = jnp.concatenate([l_pos_k, l_pos_neg, l_neg], axis=-1) * inv_temp
    pad = out_ref.shape[1] - vals.shape[1]
    if pad:
        vals = jnp.concatenate(
            [vals, jnp.zeros((vals.shape[0], pad), jnp.float32)], axis=-1)
    out_ref[...] = vals                         # single full-width store


# ------------------------------ helpers -------------------------------------

def _pick_bank_tile(Q, D, B, itemsize):
    """Bank columns per grid step.

    * Budget: double-buffered {(D,tm) bank tile + (B,tm) f32 out tile}
      <= ~8 MiB (safe under every generation's scoped-VMEM default while
      big enough that per-step overhead is amortized: measured 256 cols ->
      ~63% HBM roofline, 512 -> 85%, 1024 -> 86%).
    * Keep >= 2 grid steps when Q >= 256 so v7x's two TensorCores both get
      work under dimension_semantics=("parallel",); ~free on 1-TC v5e/v6e.
    * Prefer tm | Q so the final tile's stores are unmasked.
    """
    if Q <= 256:
        return Q                                  # single resident tile
    budget = 8 * 1024 * 1024
    per_col = 2 * (D * itemsize + B * 4)          # 2x for double-buffering
    cap = max(budget // max(per_col, 1), 128)
    cap = min(cap, max((Q // 2 // 128) * 128, 128))   # >= 2 grid steps
    cap = max((cap // 128) * 128, 128)
    for tm in range(cap, 127, -128):              # prefer a divisor of Q
        if Q % tm == 0:
            return tm
    return cap


def _assemble_inter_output(head, lneg_bank, left_w):
    """Torch-compatible (2B, 1+M) view.  Materializes the duplicated logits;
    prefer assemble_output=False (use the pieces) in real training loops."""
    return jnp.concatenate(
        [head[:, :left_w], jnp.concatenate([lneg_bank, lneg_bank], axis=0)],
        axis=1)


# ------------------------------ JAX wrappers --------------------------------

@functools.partial(jax.jit,
                   static_argnames=("temperature", "bank_tile", "bank_buffers"),
                   donate_argnums=(5,))
def _forward_inter(q, k, pos_set, neg_set, k_all, memory_t, index, *,
                   temperature, bank_tile=None, bank_buffers=None):
    """memory_t is the bank stored TRANSPOSED as (D, Q) (bf16 recommended).
    It is donated, so the FIFO update is an in-place column scatter."""
    B, D = q.shape
    Q = memory_t.shape[1]
    Nn = neg_set.shape[1]
    inv_t = 1.0 / temperature
    n_local = B * Nn
    neg_flat_t = neg_set.reshape(n_local, D).T        # (D, B*Nn), tiny

    # --- tiny head kernel: positives + local negatives (lane-dense slab) ----
    head_w = ((1 + n_local + 127) // 128) * 128
    head = pl.pallas_call(
        functools.partial(_seco_inter_head_kernel, inv_temp=inv_t),
        out_shape=jax.ShapeDtypeStruct((2 * B, head_w), jnp.float32),
        in_specs=[_VMEM, _VMEM, _VMEM, _VMEM],
        out_specs=_VMEM,
    )(q, k, pos_set, neg_flat_t)

    # --- gridded bank kernel: q @ memory.T, tiled over bank columns ---------
    mem_item = jnp.dtype(memory_t.dtype).itemsize
    tm = bank_tile if bank_tile is not None else _pick_bank_tile(
        Q, D, B, mem_item)
    tm = min(int(tm), Q)

    mem_spec_kwargs = {}
    if bank_buffers is not None:                 # e.g. 3 on v5e (DMA latency)
        mem_spec_kwargs["pipeline_mode"] = pl.Buffered(bank_buffers)
    mem_spec = pl.BlockSpec((D, tm), lambda i: (0, i), **mem_spec_kwargs)

    nbuf = 2 if bank_buffers is None else int(bank_buffers)
    vmem_need = nbuf * D * tm * mem_item + 2 * B * tm * 4 + B * D * mem_item
    vmem_limit = int(min(max(2 * vmem_need, 32 << 20), 48 << 20))  # < 64 MiB (v7x)

    cost = pl.CostEstimate(
        flops=2 * B * D * Q, transcendentals=0,
        bytes_accessed=Q * D * mem_item + B * Q * 4 + B * D * mem_item)

    lneg_bank = pl.pallas_call(
        functools.partial(_seco_bank_kernel, inv_temp=inv_t),
        out_shape=jax.ShapeDtypeStruct((B, Q), jnp.float32),
        grid=(pl.cdiv(Q, tm),),
        in_specs=[pl.BlockSpec((B, D), lambda i: (0, 0)),     # q (tiny, resident)
                  mem_spec],                                   # (D, tm) bank tile
        out_specs=pl.BlockSpec((B, tm), lambda i: (0, i)),     # lane-dense tile
        compiler_params=pltpu.CompilerParams(
            dimension_semantics=("parallel",),                 # megacore on v7x
            vmem_limit_bytes=vmem_limit),
        cost_estimate=cost,
    )(q.astype(memory_t.dtype), memory_t)

    # FIFO queue update on the donated, transposed bank: in-place column scatter.
    A = k_all.shape[0]
    out_ids = (jnp.arange(A, dtype=jnp.int32) + index) % Q
    new_memory_t = memory_t.at[:, out_ids].set(k_all.T.astype(memory_t.dtype))
    new_index = (index + A) % Q
    return head, lneg_bank, new_memory_t, new_index


@functools.partial(jax.jit, static_argnames=("temperature_intra",))
def _forward_intra(q, k, pos_set, neg_set, *, temperature_intra):
    B = q.shape[0]
    P = pos_set.shape[1]
    Nn = neg_set.shape[1]
    width = 1 + P + Nn
    padded_w = ((width + 127) // 128) * 128       # lane-dense padded output
    out_pad = pl.pallas_call(
        functools.partial(_seco_intra_kernel, inv_temp=1.0 / temperature_intra),
        out_shape=jax.ShapeDtypeStruct((B, padded_w), jnp.float32),
        in_specs=[_VMEM, _VMEM, _VMEM, _VMEM],
        out_specs=_VMEM,
    )(q, k, pos_set, neg_set)
    return out_pad[:, :width]


def memory_seco_forward(q, k, pos_set, neg_set, k_all, memory_t, index,
                        inter=True, temperature=0.1, temperature_intra=0.1,
                        bank_tile=None, bank_buffers=None,
                        assemble_output=True):
    """Mirrors MemorySeCo.forward with class_bank=False.

    `memory_t` is the queue stored transposed (D, Q); it is DONATED on the
    inter path (the caller's array is invalidated).  Returns
    (out, new_memory_t, new_index).  With assemble_output=False the inter
    path returns the pieces (head_slab, lneg_bank) instead of the
    torch-shaped (2B, 1+M) array, avoiding the duplicated-logits traffic.
    """
    if inter:
        head, lneg_bank, new_mem, new_idx = _forward_inter(
            q, k, pos_set, neg_set, k_all, memory_t, index,
            temperature=temperature, bank_tile=bank_tile,
            bank_buffers=bank_buffers)
        if not assemble_output:
            return (head, lneg_bank), new_mem, new_idx
        left_w = 1 + q.shape[0] * neg_set.shape[1]
        return _assemble_inter_output(head, lneg_bank, left_w), new_mem, new_idx
    out = _forward_intra(q, k, pos_set, neg_set,
                         temperature_intra=temperature_intra)
    return out, memory_t, index


# ------------------------------ references ----------------------------------

def _ref_inter(q, k, pos_set, neg_set, bank, temperature):
    """bank is (Q, D) in its storage dtype (e.g. bf16)."""
    D = q.shape[1]
    l_pos_k = jnp.sum(q * k, -1, keepdims=True)
    l_pos_set = jnp.mean(jnp.sum(q[:, None, :] * pos_set, -1, keepdims=True),
                         axis=1)
    l_neg_local = q @ neg_set.reshape(-1, D).T
    q_lp = q.astype(bank.dtype).astype(jnp.float32)
    l_neg_bank = q_lp @ bank.astype(jnp.float32).T
    l_neg = jnp.concatenate([l_neg_local, l_neg_bank], axis=1)
    pos_all = jnp.concatenate([l_pos_k, l_pos_set], axis=0)
    out = jnp.concatenate([pos_all, jnp.tile(l_neg, (2, 1))], axis=1)
    return out / temperature


def _ref_intra(q, k, pos_set, neg_set, temperature_intra):
    l_pos_k = jnp.sum(q * k, -1, keepdims=True)
    l_pos_neg = jnp.squeeze(q[:, None, :] @ jnp.swapaxes(pos_set, 1, 2), axis=1)
    l_neg = jnp.squeeze(q[:, None, :] @ jnp.swapaxes(neg_set, 1, 2), axis=1)
    out = jnp.concatenate([l_pos_k,
                           jnp.concatenate([l_pos_neg, l_neg], 1)], -1)
    return out / temperature_intra


# --------------------------------- main --------------------------------------

if __name__ == "__main__":
    B, D, P, Nn, Q, A = 8, 32, 4, 4, 1024, 8
    temperature, temperature_intra = 0.1, 0.1

    key = jax.random.PRNGKey(0)
    kq, kk, kp, kn, ka, km = jax.random.split(key, 6)

    q = jax.random.normal(kq, (B, D), jnp.float32)
    k = jax.random.normal(kk, (B, D), jnp.float32)
    pos_set = jax.random.normal(kp, (B, P, D), jnp.float32)
    neg_set = jax.random.normal(kn, (B, Nn, D), jnp.float32)
    k_all = jax.random.normal(ka, (A, D), jnp.float32)

    # deterministic bank init (matches torch.rand(...)*2*stdv - stdv)
    stdv = 1.0 / math.sqrt(D / 3)
    memory = jax.random.uniform(km, (Q, D), jnp.float32) * 2 * stdv - stdv
    bank = memory.astype(jnp.bfloat16)        # bf16 bank: half the HBM read bytes
    bank_t = bank.T                           # stored transposed (D, Q)
    index = jnp.int32(0)

    # References BEFORE the donated call (donation invalidates `bank_t`).
    ref_inter = _ref_inter(q, k, pos_set, neg_set, bank, temperature)
    ref_bank_new_t = bank.at[(jnp.arange(A) + 0) % Q].set(
        k_all.astype(jnp.bfloat16)).T
    ref_inter, ref_bank_new_t = jax.block_until_ready((ref_inter, ref_bank_new_t))

    # inter=True path (auto tile: 512 columns -> 2 parallel grid steps)
    out_inter, new_bank_t, new_index = memory_seco_forward(
        q, k, pos_set, neg_set, k_all, bank_t, index,
        inter=True, temperature=temperature)
    out_inter, new_bank_t = jax.block_until_ready((out_inter, new_bank_t))

    assert out_inter.shape == (2 * B, 1 + B * Nn + Q)
    assert jnp.allclose(out_inter, ref_inter, atol=2e-2, rtol=2e-3)
    assert jnp.array_equal(new_bank_t, ref_bank_new_t)
    assert int(new_index) == A % Q

    # inter=False path (does not touch the bank)
    out_intra, _, _ = memory_seco_forward(
        q, k, pos_set, neg_set, k_all, new_bank_t, new_index,
        inter=False, temperature_intra=temperature_intra)
    out_intra = jax.block_until_ready(out_intra)
    ref_intra = _ref_intra(q, k, pos_set, neg_set, temperature_intra)
    assert out_intra.shape == (B, 1 + P + Nn)
    assert jnp.allclose(out_intra, ref_intra, atol=1e-4, rtol=1e-4)

    print("KERNEL_OK")
</pallas_src>

<mosaic_0001>
module attributes {stable_mosaic.version = 11 : i64} {
  func.func @_seco_inter_head_kernel(%arg0: memref<8x32xf32, #tpu.memory_space<vmem>>, %arg1: memref<8x32xf32, #tpu.memory_space<vmem>>, %arg2: memref<8x4x32xf32, #tpu.memory_space<vmem>>, %arg3: memref<32x32xf32, #tpu.memory_space<vmem>>, %arg4: memref<16x128xf32, #tpu.memory_space<vmem>>) attributes {dimension_semantics = [], scalar_prefetch = 0 : i64, scratch_operands = 0 : i64, tpu.core_type = #tpu.core_type<tc>} {
    %c0 = arith.constant 0 : index
    %c0_0 = arith.constant 0 : index
    %0 = vector.load %arg0[%c0, %c0_0] : memref<8x32xf32, #tpu.memory_space<vmem>>, vector<8x32xf32>
    %c0_1 = arith.constant 0 : index
    %c0_2 = arith.constant 0 : index
    %1 = vector.load %arg1[%c0_1, %c0_2] : memref<8x32xf32, #tpu.memory_space<vmem>>, vector<8x32xf32>
    %c0_3 = arith.constant 0 : index
    %c0_4 = arith.constant 0 : index
    %c0_5 = arith.constant 0 : index
    %2 = vector.load %arg2[%c0_3, %c0_4, %c0_5] : memref<8x4x32xf32, #tpu.memory_space<vmem>>, vector<8x4x32xf32>
    %3 = arith.mulf %0, %1 : vector<8x32xf32>
    %cst = arith.constant dense<0.000000e+00> : vector<8xf32>
    %4 = vector.multi_reduction <add>, %3, %cst [1] : vector<8x32xf32> to vector<8xf32>
    %5 = vector.shape_cast %4 : vector<8xf32> to vector<8x1xf32>
    %6 = vector.shape_cast %0 : vector<8x32xf32> to vector<8x1x32xf32>
    %7 = vector.broadcast %6 : vector<8x1x32xf32> to vector<8x4x32xf32>
    %8 = arith.mulf %7, %2 : vector<8x4x32xf32>
    %cst_6 = arith.constant dense<0.000000e+00> : vector<8x4xf32>
    %9 = vector.multi_reduction <add>, %8, %cst_6 [2] : vector<8x4x32xf32> to vector<8x4xf32>
    %cst_7 = arith.constant dense<0.000000e+00> : vector<8xf32>
    %10 = vector.multi_reduction <add>, %9, %cst_7 [1] : vector<8x4xf32> to vector<8xf32>
    %11 = vector.shape_cast %10 : vector<8xf32> to vector<8x1xf32>
    %cst_8 = arith.constant 4.000000e+00 : f32
    %12 = vector.broadcast %cst_8 : f32 to vector<8x1xf32>
    %13 = arith.divf %11, %12 : vector<8x1xf32>
    %c0_9 = arith.constant 0 : index
    %c0_10 = arith.constant 0 : index
    %14 = vector.load %arg0[%c0_9, %c0_10] : memref<8x32xf32, #tpu.memory_space<vmem>>, vector<8x32xf32>
    %c0_11 = arith.constant 0 : index
    %c0_12 = arith.constant 0 : index
    %15 = vector.load %arg3[%c0_11, %c0_12] : memref<32x32xf32, #tpu.memory_space<vmem>>, vector<32x32xf32>
    %cst_13 = arith.constant dense<0.000000e+00> : vector<8x32xf32>
    %16 = tpu.matmul %14, %15, %cst_13 {dimension_numbers = #tpu.dot_dimension_numbers<[1], [0], [0], [1], [0, 0, 1, 1], [], []>} : vector<8x32xf32>, vector<32x32xf32>, vector<8x32xf32> -> vector<8x32xf32>
    %17 = tpu.concatenate %5, %16 in 1 : vector<8x1xf32>, vector<8x32xf32> -> vector<8x33xf32>
    %cst_14 = arith.constant 1.000000e+01 : f32
    %18 = vector.broadcast %cst_14 : f32 to vector<8x33xf32>
    %19 = arith.mulf %17, %18 : vector<8x33xf32>
    %20 = tpu.concatenate %13, %16 in 1 : vector<8x1xf32>, vector<8x32xf32> -> vector<8x33xf32>
    %cst_15 = arith.constant 1.000000e+01 : f32
    %21 = vector.broadcast %cst_15 : f32 to vector<8x33xf32>
    %22 = arith.mulf %20, %21 : vector<8x33xf32>
    %cst_16 = arith.constant 0.000000e+00 : f32
    %23 = vector.broadcast %cst_16 : f32 to vector<8x95xf32>
    %24 = tpu.concatenate %19, %23 in 1 : vector<8x33xf32>, vector<8x95xf32> -> vector<8x128xf32>
    %25 = tpu.concatenate %22, %23 in 1 : vector<8x33xf32>, vector<8x95xf32> -> vector<8x128xf32>
    %c0_17 = arith.constant 0 : index
    %c0_18 = arith.constant 0 : index
    %26 = vector.load %arg4[%c0_17, %c0_18] : memref<16x128xf32, #tpu.memory_space<vmem>>, vector<8x128xf32>
    tpu.vector_store %arg4[%c0_17, %c0_18], %24 {strides = array<i32>} : memref<16x128xf32, #tpu.memory_space<vmem>>, vector<8x128xf32>,
    %c8 = arith.constant 8 : index
    %c0_19 = arith.constant 0 : index
    %27 = vector.load %arg4[%c8, %c0_19] : memref<16x128xf32, #tpu.memory_space<vmem>>, vector<8x128xf32>
    tpu.vector_store %arg4[%c8, %c0_19], %25 {strides = array<i32>} : memref<16x128xf32, #tpu.memory_space<vmem>>, vector<8x128xf32>,
    return
  }
}

module attributes {stable_mosaic.version = 11 : i64} {
  func.func @_seco_bank_kernel(%arg0: i32, %arg1: memref<8x32xbf16, #tpu.memory_space<vmem>>, %arg2: memref<32x512xbf16, #tpu.memory_space<vmem>>, %arg3: memref<8x512xf32, #tpu.memory_space<vmem>>) attributes {dimension_semantics = [#tpu.dimension_semantics<parallel>], iteration_bounds = array<i64: 2>, scalar_prefetch = 0 : i64, scratch_operands = 0 : i64, tpu.core_type = #tpu.core_type<tc>, window_params = [{pipeline_mode = #tpu.pipeline_mode<synchronous>, transform_indices = @transform_0, window_bounds = array<i64: 8, 32>}, {transform_indices = @transform_1, window_bounds = array<i64: 32, 512>}, {transform_indices = @transform_2, window_bounds = array<i64: 8, 512>}]} {
    %c0 = arith.constant 0 : index
    %c0_0 = arith.constant 0 : index
    %0 = vector.load %arg1[%c0, %c0_0] : memref<8x32xbf16, #tpu.memory_space<vmem>>, vector<8x32xbf16>
    %c0_1 = arith.constant 0 : index
    %c0_2 = arith.constant 0 : index
    %1 = vector.load %arg2[%c0_1, %c0_2] : memref<32x512xbf16, #tpu.memory_space<vmem>>, vector<32x512xbf16>
    %cst = arith.constant dense<0.000000e+00> : vector<8x512xf32>
    %2 = tpu.matmul %0, %1, %cst {dimension_numbers = #tpu.dot_dimension_numbers<[1], [0], [0], [1], [0, 0, 1, 1], [], []>} : vector<8x32xbf16>, vector<32x512xbf16>, vector<8x512xf32> -> vector<8x512xf32>
    %cst_3 = arith.constant 1.000000e+01 : f32
    %3 = vector.broadcast %cst_3 : f32 to vector<8x512xf32>
    %4 = arith.mulf %2, %3 : vector<8x512xf32>
    %c0_4 = arith.constant 0 : index
    %c0_5 = arith.constant 0 : index
    %5 = vector.load %arg3[%c0_4, %c0_5] : memref<8x512xf32, #tpu.memory_space<vmem>>, vector<8x512xf32>
    tpu.vector_store %arg3[%c0_4, %c0_5], %4 {strides = array<i32>} : memref<8x512xf32, #tpu.memory_space<vmem>>, vector<8x512xf32>,
    return
  }
  func.func @transform_0(%arg0: i32) -> (i32, i32) {
    %c0_i32 = arith.constant 0 : i32
    %c0_i32_0 = arith.constant 0 : i32
    %c0_i32_1 = arith.constant 0 : i32
    return %c0_i32, %c0_i32_0 : i32, i32
  }
  func.func @transform_1(%arg0: i32) -> (i32, i32) {
    %c0_i32 = arith.constant 0 : i32
    %c0_i32_0 = arith.constant 0 : i32
    return %c0_i32, %arg0 : i32, i32
  }
  func.func @transform_2(%arg0: i32) -> (i32, i32) {
    %c0_i32 = arith.constant 0 : i32
    %c0_i32_0 = arith.constant 0 : i32
    return %c0_i32, %arg0 : i32, i32
  }
}

</mosaic_0001>

<bundles_post_ra>
// kernel: _forward_inter.2
= control target key start
LH: loop header
LB: loop body
LE: loop exit
PB: predicated region body
PF: predicated region fallthrough
CT: control target
= control target key end

     0   :  { %9 = vsyncpa [#allocation3], 0  ;;  %s568_s0 = inlined_call_operand.hbm [shape: f32[8,32], index: 0, kind: input, shape index: {}]   ;;  %s569_s1 = inlined_call_operand.hbm [shape: f32[8,32], index: 1, kind: input, shape index: {}]   ;;  %s570_s2 = inlined_call_operand.hbm [shape: f32[8,4,32], index: 2, kind: input, shape index: {}]   ;;  %s571_s3 = inlined_call_operand.vmem [shape: f32[32,32], index: 3, kind: input, shape index: {}]   ;;  %s572_s4 = inlined_call_operand.hbm [shape: f32[16,128], index: 4, kind: output, shape index: {}]  }
   0x1   :  { %10 = vsyncpa [#allocation6], 0 }
   0x2   :  { %11 = vsyncpa [#allocation4], 0  ;;  %s480_s15 = smov [#allocation5]   ;;  %s481_s17 = smov [#allocation2]  }
   0x3   :  { %s28_s16 = sshll.u32 %s480_s15, 4  ;;  %s18_s18 = sshll.u32 %s481_s17, 4  ;;  %s29_s16 = int_to_ptr.vmem [resolvable:$true] %s28_s16  ;;  %s19_s18 = int_to_ptr.vmem [resolvable:$true] %s18_s18 }
   0x4   :  { %s402_s19 = scalar_lea.vmem %s29_s16, 128  ;;  %p407_p1 = scmp.lt.s32.totalorder %s29_s16, %s29_s16 }
   0x5   :  { %p403_p0 = scmp.ne.s32.totalorder %s29_s16, %s402_s19  ;;  %p408_p2 = scmp.lt.s32.totalorder %s402_s19, %s402_s19 }
   0x7   :  { %p409_p3 = por %p408_p2, %p407_p1 }
   0x9   :  { %p410_p4 = pnand %p409_p3, %p403_p0 }
   0xb   :  { %413 = shalt.err (!%p410_p4)
}
   0xc   :  { %31 = dma.hbm_to_vmem [thread:$0]  %s569_s1, 128, %s29_s16, [#allocation6]  }
   0xd   :  { %s422_s22 = scalar_lea.vmem %s19_s18, 128  ;;  %p427_p6 = scmp.lt.s32.totalorder %s19_s18, %s19_s18 }
   0xe   :  { %p423_p5 = scmp.ne.s32.totalorder %s19_s18, %s422_s22  ;;  %p428_p7 = scmp.lt.s32.totalorder %s422_s22, %s422_s22 }
  0x10   :  { %p429_p8 = por %p428_p7, %p427_p6 }
  0x12   :  { %p430_p9 = pnand %p429_p8, %p423_p5 }
  0x14   :  { %433 = shalt.err (!%p430_p9)
}
  0x15   :  { %21 = dma.hbm_to_vmem [thread:$0]  %s568_s0, 128, %s19_s18, [#allocation3]  }
  0x16   :  { %s482_s25 = smov [#allocation7]  }
  0x17   :  { %s37_s26 = sshll.u32 %s482_s25, 4  ;;  %s38_s26 = int_to_ptr.vmem [resolvable:$true] %s37_s26 }
  0x18   :  { %s442_s27 = scalar_lea.vmem %s38_s26, 512  ;;  %p447_p11 = scmp.lt.s32.totalorder %s38_s26, %s38_s26 }
  0x19   :  { %p443_p10 = scmp.ne.s32.totalorder %s38_s26, %s442_s27  ;;  %p448_p12 = scmp.lt.s32.totalorder %s442_s27, %s442_s27 }
  0x1b   :  { %p449_p13 = por %p448_p12, %p447_p11 }
  0x1d   :  { %p450_p0 = pnand %p449_p13, %p443_p10 }
  0x1f   :  { %453 = shalt.err (!%p450_p0)
}
  0x20   :  { %s483_s1 = smov 64   ;;  %s484_s28 = smov 4  }
  0x21   :  { %43 = dma.hbm_to_vmem [thread:$0]  %s570_s2, 512, %s38_s26, [#allocation6], %s483_s1, %s483_s1, %s484_s28  }
  0x22   :  { %474 = dma.done.wait [#allocation3], 128  }
  0x23   :  { %475 = vsyncadd [#allocation3], 4294967168 }
  0x24   :  { %476 = dma.done.wait [#allocation6], 640  }
  0x25   :  { %477 = vsyncadd [#allocation6], 4294966656  ;;  %v75_v0 = vlaneseq  ;;  %v485_v1 = vmov 0.0   ;;  %vm486_vm0 = vmmov 0   ;;  %v487_v2 = vmov 1966171168  }
  0x26   :  { %370 = vmatprep.subr.mxu0 %v485_v1  ;;  %378 = vmatprep.mubr.msk.f32.mxu0 %vm486_vm0, %v485_v1  ;;  %v73_v3 = vunpack.c.l.s4 %v487_v2  ;;  %v259_v9 = vld [vmem:[%s571_s3 + $0x18] sm:$0xff]  ;;  %v258_v10 = vld [vmem:[%s571_s3 + $0x10] sm:$0xff]  ;;  %v534_v11 = vld [vmem:[#allocation2] sm:$0xff]  ;;  %vm66_vm1 = vcmask 261120   ;;  %vm168_vm2 = vcmask 257024   ;;  %vm235_vm3 = vcmask 1041409  }
  0x27   :  { %v76_v4 = vshrl.u32 %v75_v0, 7  ;;  %v202_v5 = vand.u32 127, %v75_v0  ;;  %371 = vmatpush3.msra.mxu0 %v259_v9  ;;  %v257_v12 = vld [vmem:[%s571_s3 + $0x8] sm:$0xff]  ;;  %v71_v13 = vcombine.high %v534_v11, %v534_v11  ;;  %v256_v16 = vld [vmem:[%s571_s3] sm:$0xff]  ;;  %v57_v20 = vld [vmem:[#allocation7] sm:$0xf] }
  0x28   :  { %v74_v6 = vunpack.c.0.s8 %v73_v3  ;;  %372 = vmatprep.subr.mxu0 %v485_v1  ;;  %v59_v25 = vld [vmem:[#allocation7 + $0x8] sm:$0xf]  ;;  %v58_v26 = vld [vmem:[#allocation7 + $0x4] sm:$0xf]  ;;  %v61_v32 = vld [vmem:[#allocation7 + $0x10] sm:$0xf] }
  0x29   :  { %v526_v7 = vsub.s32 %v202_v5, %v76_v4  ;;  %v122_v15 = vsub.s32 0, %v76_v4  ;;  %373 = vmatpush3.msra.mxu0 %v258_v10  ;;  %v60_v33 = vld [vmem:[#allocation7 + $0xc] sm:$0xf]  ;;  %v62_v42 = vld [vmem:[#allocation7 + $0x14] sm:$0xf]  ;;  %v56_v60 = vld [vmem:[#allocation5] sm:$0xff] }
  0x2a   :  { %v77_v8 = vsub.s32 %v74_v6, %v76_v4  ;;  %374 = vmatprep.subr.mxu0 %v485_v1  ;;  %v63_v49 = vld [vmem:[#allocation7 + $0x18] sm:$0xf]  ;;  %v64_v53 = vld [vmem:[#allocation7 + $0x1c] sm:$0xf]  ;;  %v65_v61 = vmul.f32 %v56_v60, %v534_v11  ;;  %vm237_vm4 = vcmask 1042434   ;;  %vm239_vm5 = vcmask 1043459  }
  0x2b   :  { %375 = vmatpush3.msra.mxu0 %v257_v12  ;;  %vm241_vm6 = vcmask 1044484   ;;  %vm243_vm7 = vcmask 1045509   ;;  %vm245_vm8 = vcmask 1046534   ;;  %vm247_vm9 = vcmask 1047559   ;;  %s488_s3 = smov 1   ;;  %s489_s11 = smov [#allocation8]  }
  0x2c   :  { %v78_v14 = vrot.slane %v534_v11, %v77_v8  ;;  %v85_v19 = vrot.slane %v71_v13, %v77_v8  ;;  %376 = vmatprep.subr.mxu0 %v485_v1  ;;  %v67_v62 = vsel %vm66_vm1, %v65_v61, 0.0  ;;  %vm250_vm10 = vcmask 31744   ;;  %s351_s12 = sshll.u32 %s489_s11, 4  ;;  %s352_s12 = int_to_ptr.vmem [resolvable:$true] %s351_s12 }
  0x2d   :  { %377 = vmatpush3.msra.mxu0 %v256_v16  ;;  %vm336_vm11 = vcmask 7168   ;;  %vm341_vm12 = vcmask 269312   ;;  %s454_s13 = scalar_lea.vmem %s352_s12, 256  ;;  %p459_p2 = scmp.lt.s32.totalorder %s352_s12, %s352_s12 }
  0x2e   :  { %v94_v17 = vrot.slane %v78_v14, %v77_v8  ;;  %v86_v18 = vcombine.high %v78_v14, %v78_v14  ;;  %v101_v24 = vrot.slane %v85_v19, %v77_v8  ;;  %v87_v27 = vcombine.high %v85_v19, %v85_v19  ;;  %379 = vmatmul.mubr.msk.f32.vlgmr.msra.gmra.mxu0 %vm66_vm1, %v534_v11  ;;  %p455_p1 = scmp.ne.s32.totalorder %s352_s12, %s454_s13  ;;  %p460_p3 = scmp.lt.s32.totalorder %s454_s13, %s454_s13 }
  0x30   :  { %v123_v21 = vrot.slane %v94_v17, %v122_v15  ;;  %v116_v22 = vcombine.high %v94_v17, %v94_v17  ;;  %v108_v23 = vrot.slane %v86_v18, %v77_v8  ;;  %v139_v34 = vrot.slane %v101_v24, %v122_v15  ;;  %p461_p4 = por %p460_p3, %p459_p2 }
  0x31   :  { %v115_v35 = vrot.slane %v87_v27, %v77_v8  ;;  %v117_v36 = vcombine.high %v101_v24, %v101_v24 }
  0x32   :  { %v160_v28 = vmul.f32 %v123_v21, %v57_v20  ;;  %v131_v29 = vrot.slane %v116_v22, %v122_v15  ;;  %v127_v30 = vrot.slane %v108_v23, %v122_v15  ;;  %v118_v31 = vcombine.high %v108_v23, %v108_v23  ;;  %p462_p5 = pnand %p461_p4, %p455_p1 }
  0x33   :  { %v164_v41 = vmul.f32 %v139_v34, %v61_v32  ;;  %v143_v43 = vrot.slane %v115_v35, %v122_v15  ;;  %v119_v44 = vcombine.high %v115_v35, %v115_v35  ;;  %v147_v48 = vrot.slane %v117_v36, %v122_v15 }
  0x34   :  { %v169_v37 = vsel %vm168_vm2, %v160_v28, 0.0  ;;  %v162_v38 = vmul.f32 %v131_v29, %v59_v25  ;;  %v161_v39 = vmul.f32 %v127_v30, %v58_v26  ;;  %v135_v40 = vrot.slane %v118_v31, %v122_v15 }
  0x35   :  { %170 = vadd.xlane.f32.xlu0 %v169_v37  ;;  %v165_v51 = vmul.f32 %v143_v43, %v62_v42  ;;  %v151_v52 = vrot.slane %v119_v44, %v122_v15  ;;  %v181_v54 = vsel %vm168_vm2, %v164_v41, 0.0  ;;  %v166_v55 = vmul.f32 %v147_v48, %v63_v49 }
  0x36   :  { %v175_v45 = vsel %vm168_vm2, %v162_v38, 0.0  ;;  %v172_v46 = vsel %vm168_vm2, %v161_v39, 0.0  ;;  %v163_v47 = vmul.f32 %v135_v40, %v60_v33 }
  0x37   :  { %176 = vadd.xlane.f32.xlu1 %v175_v45  ;;  %v184_v56 = vsel %vm168_vm2, %v165_v51, 0.0  ;;  %v167_v57 = vmul.f32 %v151_v52, %v64_v53  ;;  %v187_v58 = vsel %vm168_vm2, %v166_v55, 0.0 }
  0x38   :  { %v178_v50 = vsel %vm168_vm2, %v163_v47, 0.0 }
  0x39   :  { %173 = vadd.xlane.f32.xlu0 %v172_v46  ;;  %v190_v59 = vsel %vm168_vm2, %v167_v57, 0.0 }
  0x3b   :  { %179 = vadd.xlane.f32.xlu1 %v178_v50 }
  0x3d   :  { %182 = vadd.xlane.f32.xlu0 %v181_v54 }
  0x3f   :  { %185 = vadd.xlane.f32.xlu1 %v184_v56 }
  0x41   :  { %188 = vadd.xlane.f32.xlu0 %v187_v58 }
  0x43   :  { %191 = vadd.xlane.f32.xlu1 %v190_v59 }
  0x47   :  { %68 = vadd.xlane.f32.xlu1 %v67_v62 }
  0xbe   :  { %v171_v63 = vpop.xlane.xlu0 %170 }
  0xbf   :  { %v206_v1 = vrot.slane %v171_v63, %v526_v7 }
  0xc0   :  { %v177_v0 = vpop.xlane.xlu1 %176 }
  0xc1   :  { %v214_v2 = vrot.slane %v177_v0, %v526_v7 }
  0xc2   :  { %v174_v3 = vpop.xlane.xlu0 %173 }
  0xc3   :  { %v210_v4 = vrot.slane %v174_v3, %v526_v7 }
  0xc4   :  { %v180_v5 = vpop.xlane.xlu1 %179 }
  0xc5   :  { %v236_v6 = vsel %vm235_vm3, %v210_v4, %v206_v1  ;;  %v218_v8 = vrot.slane %v180_v5, %v526_v7 }
  0xc6   :  { %v238_v9 = vsel %vm237_vm4, %v214_v2, %v236_v6  ;;  %v183_v10 = vpop.xlane.xlu0 %182 }
  0xc7   :  { %v240_v11 = vsel %vm239_vm5, %v218_v8, %v238_v9  ;;  %v222_v12 = vrot.slane %v183_v10, %v526_v7 }
  0xc8   :  { %v186_v13 = vpop.xlane.xlu1 %185 }
  0xc9   :  { %v242_v14 = vsel %vm241_vm6, %v222_v12, %v240_v11  ;;  %v226_v15 = vrot.slane %v186_v13, %v526_v7 }
  0xca   :  { %v189_v16 = vpop.xlane.xlu0 %188 }
  0xcb   :  { %v244_v17 = vsel %vm243_vm7, %v226_v15, %v242_v14  ;;  %v230_v18 = vrot.slane %v189_v16, %v526_v7 }
  0xcc   :  { %v192_v19 = vpop.xlane.xlu1 %191 }
  0xcd   :  { %v234_v20 = vrot.slane %v192_v19, %v526_v7  ;;  %v246_v21 = vsel %vm245_vm8, %v230_v18, %v244_v17 }
  0xcf   :  { %v248_v22 = vsel %vm247_vm9, %v234_v20, %v246_v21 }
  0xd0   :  { %v251_v23 = vsel %vm250_vm10, %v248_v22, 0.0  ;;  %v69_v27 = vpop.xlane.xlu1 %68 }
  0xd1   :  { %252 = vadd.xlane.f32.xlu0 %v251_v23 }
  0xee   :  { %v328_v24 = vpop.f32.mrf.mxu0 }
  0xef   :  { %333 = vrot.lane.b32.xlu0 %v328_v24, %s488_s3 }
  0xf0   :  { %v380_v25 = vpop.f32.mrf.mxu0 }
 0x15a   :  { %v253_v26 = vpop.xlane.xlu0 %252 }
 0x15b   :  { %v255_v28 = vmul.f32 0.25, %v253_v26 }
 0x161   :  { %v334_v29 = vpop.permute.xlu0 %333 }
 0x162   :  { %v339_v30 = vsel %vm336_vm11, %v255_v28, %v334_v29  ;;  %v337_v31 = vsel %vm336_vm11, %v69_v27, %v334_v29 }
 0x163   :  { %v340_v7 = vmul.f32 10.0, %v339_v30  ;;  %v338_v32 = vmul.f32 10.0, %v337_v31 }
 0x165   :  { %v343_v33 = vsel %vm341_vm12, %v340_v7, 0.0  ;;  %v342_v34 = vsel %vm341_vm12, %v338_v32, 0.0 }
 0x166   :  { %345 = vst [vmem:[#allocation8 + $0x8] sm:$0xff] %v343_v33  ;;  %344 = vst [vmem:[#allocation8] sm:$0xff] %v342_v34 }
 0x167   :  { %465 = shalt.err (!%p462_p5)
}
 0x168   :  { %s490_s14 = smov 128   ;;  %s491_s15 = smov 8  }
 0x169   :  { %357 = dma.vmem_to_hbm [thread:$0]  %s352_s12, 256, %s572_s4, [#allocation4], %s490_s14, %s490_s14, %s491_s15  }
 0x16a   :  { %478 = dma.done.wait [#allocation4], 256  }
 0x16b   :  { %479 = vsyncadd [#allocation4], 4294967040 }
 0x16c   :  { %361 = vsyncpa [#allocation3], 1 }
 0x16d   :  { %362 = vsyncpa [#allocation6], 1 }
 0x16e   :  { %363 = vsyncpa [#allocation4], 1 }

// kernel: _forward_inter.3
= control target key start
LH: loop header
LB: loop body
LE: loop exit
PB: predicated region body
PF: predicated region fallthrough
CT: control target
= control target key end

     0   :  { %7 = vsyncpa [#allocation4], 0  ;;  %s671_s0 = inlined_call_operand.vmem [shape: bf16[8,32], index: 0, kind: input, shape index: {}]   ;;  %s672_s1 = inlined_call_operand.vmem [shape: bf16[32,1024], index: 1, kind: input, shape index: {}]   ;;  %s673_s2 = inlined_call_operand.hbm [shape: f32[8,1024], index: 2, kind: output, shape index: {}]  }
   0x1   :  { %9 = vsyncpa [#allocation4 + $0x1], 0  ;;  %s559_s9 = smov 0   ;;  %s561_s10 = smov 0  }
   0x2   :  { %s563_s11 = smov 0   ;;  %s565_s12 = smov 0  }
   0x3 LB: > { %s401_s13 = sadd.s32 4294967295, %s540_s12   ;;  %s402_s14 = sadd.s32 4294967294, %s540_s12   ;;  %s540_s12 = sphi %s565_s12, %s679_s12   ;;  %s536_s11 = sphi %s563_s11, %s678_s11   ;;  %s532_s10 = sphi %s561_s10, %s677_s10   ;;  %s528_s9 = sphi %s559_s9, %s676_s9  }
   0x4   : > { %s582_s15 = sadd.s32 1, %s540_s12   ;;  %s43_s16 = sadd.s32 1, %s536_s11 }
   0x5   : > { %s40_s17 = ssub.s32 %s540_s12, %s582_s15  ;;  %p50_p0 = scmp.ne.s32.totalorder %s536_s11, %s532_s10 }
   0x6   : > { %p41_p1 = scmp.eq.s32.totalorder %s40_s17, 0  ;;  %p51_p2 = scmp.eq.s32.totalorder %s540_s12, 0 }
   0x7   : > { %p80_p3 = scmp.eq.s32.totalorder %s401_s13, 1  ;;  %p85_p4 = scmp.ne.s32.totalorder %s532_s10, %s528_s9 }
   0x8   : > { %s595_s18 = scalar_select %p41_p1, %s536_s11, %s43_s16  }
   0x9   : > { %p52_p5 = por %p51_p2, %p50_p0  ;;  %p597_p6 = por %p80_p3, %p50_p0 }
   0xa   : > { %p86_p7 = scmp.eq.s32.totalorder %s402_s14, 1  ;;  %p404_p9 = scmp.ge.s32.totalorder %s540_s12, 2 }
   0xc   : > { %p601_p8 = por %p86_p7, %p85_p4  ;;  %105 = sbr.rel (%p404_p9) target bundleno = 25 (0x19), region = 20 }
  0x11   : > { %108 = sbr.rel (!%p52_p5) target bundleno = 25 (0x19), region = 24  ;;  %s110_s21 = sand.u32 (%p52_p5), 1, %s536_s11  }
  0x12   : > { %s426_s22 = sshll.u32 (%p52_p5), %s540_s12, 4  ;;  %s405_s23 = sshll.u32 (%p52_p5), %s110_s21, 6 }
  0x13   : > { %s115_s26 = scalar_lea.vmem (%p52_p5), %s672_s1, %s426_s22  ;;  %s112_s27 = scalar_lea.vmem (%p52_p5), [#allocation2], %s405_s23 }
  0x14   : > { %v128_v0 = vld [vmem:[%s115_s26] sm:$0xff] (%p52_p5)  ;;  %v130_v1 = vld [vmem:[%s115_s26 + $0x8] sm:$0xff] (%p52_p5) }
  0x15   : > { %v132_v2 = vld [vmem:[%s115_s26 + $0x20] sm:$0xff] (%p52_p5)  ;;  %129 = vst [vmem:[%s112_s27] sm:$0xff] (%p52_p5), %v128_v0  ;;  %131 = vst [vmem:[%s112_s27 + $0x8] sm:$0xff] (%p52_p5), %v130_v1  ;;  %v134_v3 = vld [vmem:[%s115_s26 + $0x28] sm:$0xff] (%p52_p5) }
  0x16   : > { %133 = vst [vmem:[%s112_s27 + $0x10] sm:$0xff] %v132_v2  ;;  %v136_v4 = vld [vmem:[%s115_s26 + $0x40] sm:$0xff]  ;;  %v138_v5 = vld [vmem:[%s115_s26 + $0x48] sm:$0xff]  ;;  %135 = vst [vmem:[%s112_s27 + $0x18] sm:$0xff] %v134_v3 }
  0x17   : > { %137 = vst [vmem:[%s112_s27 + $0x20] sm:$0xff] %v136_v4  ;;  %139 = vst [vmem:[%s112_s27 + $0x28] sm:$0xff] %v138_v5  ;;  %v140_v6 = vld [vmem:[%s115_s26 + $0x60] sm:$0xff]  ;;  %v142_v7 = vld [vmem:[%s115_s26 + $0x68] sm:$0xff] }
  0x18   : > { %141 = vst [vmem:[%s112_s27 + $0x30] sm:$0xff] %v140_v6  ;;  %143 = vst [vmem:[%s112_s27 + $0x38] sm:$0xff] %v142_v7 }
  0x19 PF: > { %p408_p10 = scmp.ge.s32.totalorder %s540_s12, 1  ;;  %p148_p11 = scmp.lt.s32.totalorder %s540_s12, 3 }
  0x1b   : > { %p149_p12 = pnand %p408_p10, %p148_p11 }
  0x1c   : > { %s616_s28 = sand.u32 (!%p149_p12), 1, %s532_s10   ;;  %s427_s6 = sshll.u32 (!%p149_p12), %s401_s13, 9 }
  0x1d   : > { %152 = sbr.rel (%p149_p12) target bundleno = 255 (0xff), region = 47  ;;  %s409_s29 = sshll.u32 (!%p149_p12), %s616_s28, 6 }
  0x1e   : > { %s157_s30 = scalar_lea.vmem (!%p149_p12), [#allocation2], %s409_s29  ;;  %s410_s5 = sshll.u32 (!%p149_p12), %s616_s28, 5 }
  0x1f   : > { %s175_s7 = scalar_lea.vmem (!%p149_p12), [#allocation3], %s410_s5  ;;  %s628_s17 = scalar_lea.hbm (!%p149_p12), %s673_s2, %s427_s6 }
  0x20   : > { %s337_s8 = sshll.u32 (!%p149_p12), %s175_s7, 4  ;;  %s323_s13 = scalar_lea.sflag (!%p149_p12), [#allocation4], %s616_s28  ;;  %s630_s8 = int_to_ptr.vmem [resolvable:$true] %s337_s8 }
  0x21   : > { %s480_s21 = scalar_lea.vmem (!%p149_p12), %s630_s8, 512  ;;  %s543_s22 = smov (!%p149_p12), [#allocation3]  }
  0x22   : > { %v542_v8 = vmov 0   ;;  %v468_v9 = vld [vmem:[%s157_s30 + $0x24] ss:$16 sps:$4 sm:$0xff]   ;;  %v470_v10 = vld [vmem:[%s157_s30 + $0x2c] ss:$16 sps:$4 sm:$0xff]   ;;  %vm228_vm0 = vcmask 261120   ;;  %p481_p13 = scmp.ne.s32.totalorder %s630_s8, %s480_s21 }
  0x23   : > { %264 = vmatprep.mubr.bf16.mxu0 %v542_v8  ;;  %305 = vmatprep.mubr.bf16.mxu1 %v542_v8  ;;  %v472_v11 = vld [vmem:[%s157_s30 + $0x20] ss:$16 sps:$4 sm:$0xff]   ;;  %v473_v12 = vld [vmem:[%s157_s30 + $0x28] ss:$16 sps:$4 sm:$0xff]   ;;  %v474_v13 = vld [vmem:[%s157_s30 + $0x4] ss:$16 sps:$4 sm:$0xff]  }
  0x24   : > { %244 = vmatprep.subr.bf16.mxu0 %v468_v9  ;;  %285 = vmatprep.subr.bf16.mxu1 %v470_v10  ;;  %v476_v14 = vld [vmem:[%s157_s30 + $0xc] ss:$16 sps:$4 sm:$0xff]   ;;  %v478_v15 = vld [vmem:[%s157_s30] ss:$16 sps:$4 sm:$0xff]   ;;  %v479_v16 = vld [vmem:[%s157_s30 + $0x8] ss:$16 sps:$4 sm:$0xff]   ;;  %p482_p0 = pnand %p481_p13, %p597_p6 }
  0x25   : > { %245 = vmatpush1.bf16.msra.mxu0 %v472_v11  ;;  %286 = vmatpush1.bf16.msra.mxu1 %v473_v12  ;;  %v179_v17 = vld [vmem:[%s671_s0] sm:$0xf]  ;;  %s484_s23 = sshll.u32 %s543_s22, 4  ;;  %s485_s23 = int_to_ptr.vmem [resolvable:$false] %s484_s23 }
  0x26   : > { %246 = vmatprep.subr.bf16.mxu0 %v474_v13  ;;  %287 = vmatprep.subr.bf16.mxu1 %v476_v14  ;;  %p483_p1 = pneg %p482_p0  ;;  %s486_s24 = scalar_lea.vmem %s485_s23, 1024 }
  0x27   : > { %p487_p2 = scmp.lt.s32.totalorder %s630_s8, %s485_s23  ;;  %p488_p3 = scmp.lt.s32.totalorder %s486_s24, %s480_s21 }
  0x29   : > { %247 = vmatpush1.bf16.msra.mxu0 %v478_v15  ;;  %288 = vmatpush1.bf16.msra.mxu1 %v479_v16  ;;  %p489_p4 = por %p488_p3, %p487_p2 }
  0x2b   : > { %p490_p5 = pnand %p489_p4, %p483_p1 }
  0x2c   : > { %419 = vmatmul.mubr.msk.bf16.vlgmr.msra.gmra.mxu0 %vm228_vm0, %v179_v17  ;;  %420 = vmatmul.mubr.msk.bf16.vlgmr.msra.gmra.mxu1 %vm228_vm0, %v179_v17 }
  0xec   : > { %v266_v18 = vpop.f32.mrf.mxu0  ;;  %v307_v19 = vpop.f32.mrf.mxu1 }
  0xed   : > { %v314_v20 = vmul.f32 10.0, %v266_v18  ;;  %v316_v21 = vmul.f32 10.0, %v307_v19 }
  0xee   : > { %v268_v22 = vpop.f32.mrf.mxu0  ;;  %v309_v23 = vpop.f32.mrf.mxu1 }
  0xef   : > { %318 = vst [vmem:[%s175_s7] sm:$0xff] %v314_v20  ;;  %320 = vst [vmem:[%s175_s7 + $0x10] sm:$0xff] %v316_v21  ;;  %v315_v24 = vmul.f32 10.0, %v268_v22  ;;  %v317_v25 = vmul.f32 10.0, %v309_v23 }
  0xf0   : > { %v270_v26 = vpop.f32.mrf.mxu0  ;;  %v311_v27 = vpop.f32.mrf.mxu1 }
  0xf1   : > { %319 = vst [vmem:[%s175_s7 + $0x8] sm:$0xff] %v315_v24  ;;  %321 = vst [vmem:[%s175_s7 + $0x18] sm:$0xff] %v317_v25 }
  0xf2   : > { %v271_v28 = vpop.f32.mrf.mxu0  ;;  %v312_v29 = vpop.f32.mrf.mxu1 }
  0xf3   : > { %493 = shalt.err (!%p490_p5)
}
  0xf4   : > { %s494_s25 = scalar_lea.hbm %s628_s17, 512  ;;  %s498_s28 = scalar_lea.hbm %s673_s2, 1024 }
  0xf5   : > { %p495_p7 = scmp.ne.s32.totalorder %s628_s17, %s494_s25  ;;  %p499_p12 = scmp.lt.s32.totalorder %s628_s17, %s673_s2 }
  0xf6   : > { %p500_p13 = scmp.lt.s32.totalorder %s498_s28, %s494_s25 }
  0xf7   : > { %p496_p10 = pnand %p495_p7, %p597_p6 }
  0xf8   : > { %p501_p0 = por %p500_p13, %p499_p12 }
  0xf9   : > { %p497_p11 = pneg %p496_p10 }
  0xfb   : > { %p502_p1 = pnand %p501_p0, %p497_p11 }
  0xfd   : > { %505 = shalt.err (!%p502_p1)
}
  0xfe   : > { %428 = dma.vmem_to_hbm [thread:$0]  (%p597_p6), %s630_s8, 512, %s628_s17, %s323_s13  }
  0xff PF: > { %s349_s3 = sand.u32 1, %s528_s9   ;;  %p431_p2 = pnand %p404_p9, %p601_p8 }
 0x100   : > { %s350_s4 = scalar_lea.sflag [#allocation4], %s349_s3 }
 0x101   : > { %p432_p3 = pneg %p431_p2 }
 0x103   : > { %523 = dma.done.wait (%p432_p3), %s350_s4, 512  }
 0x104   : > { %525 = vsyncadd (%p432_p3), %s350_s4, 4294966784  ;;  %p12_p4 = scmp.ge.s32.totalorder %s582_s15, 4   ;;  %s676_s9 = smov %s532_s10 }
 0x105   : > { %s677_s10 = smov %s536_s11  ;;  %s678_s11 = smov %s595_s18 }
 0x106   : > { %s679_s12 = smov %s582_s15  ;;  %14 = sbr.rel (!%p12_p4) target bundleno = 3 (0x3), region = 91 }
 0x10b   :  { %355 = vsyncpa [#allocation4], 1 }
 0x10c   :  { %357 = vsyncpa [#allocation4 + $0x1], 1 }

</bundles_post_ra>
